<compile_context>
chip_gen: v7x
topology: tpu7x:2x2x1
jax: 0.10.0
libtpu: 0.0.40
codegen_flags: <defaults>
</compile_context>

<pallas_src>
import functools

import jax
import jax.numpy as jnp
from jax.experimental import pallas as pl
from jax.experimental.pallas import tpu as pltpu


def _round_up(n, m):
    return ((n + m - 1) // m) * m


def soft_q_kernel(xa_ref, w1t_ref, b1_ref, w2t_ref, b2_ref, w3_ref, b3_ref,
                  out_ref):
    # fc1 (concat already fused in the wrapper): one small-K bf16 MXU matmul,
    # f32 accumulation.  Everything is feature-major: shapes are (hidden, tb).
    h1 = (jnp.dot(w1t_ref[...], xa_ref[...],
                  preferred_element_type=jnp.float32) + b1_ref[...])
    h1 = jnp.maximum(h1, 0.0).astype(jnp.bfloat16)

    # fc2: (hidden, hidden) @ (hidden, tb) bf16 MXU matmul, f32 accumulation.
    h2 = (jnp.dot(w2t_ref[...], h1,
                  preferred_element_type=jnp.float32) + b2_ref[...])
    h2 = jnp.maximum(h2, 0.0)

    # fc3 (output width 1): keep it off the MXU -> VPU multiply + sublane
    # reduction.  Result is already a lane-dense (1, tb) row.
    q = jnp.sum(h2 * w3_ref[...], axis=0, keepdims=True) + b3_ref[0]
    out_ref[...] = q.astype(out_ref.dtype)


def prepare_params(params):
    """One-time weight preprocessing, hoisted out of the per-call hot path."""
    w1, b1, w2, b2, w3, b3 = params
    in_dim, hidden = w1.shape
    in_p = _round_up(in_dim, 8)                        # sublane-align fc1's K
    w1_p = jnp.pad(w1, ((0, in_p - in_dim), (0, 0)))   # zero rows: no effect
    return (
        jnp.asarray(w1_p.T, jnp.bfloat16),             # (hidden, in_p)
        jnp.asarray(b1.reshape(hidden, 1), jnp.float32),
        jnp.asarray(w2.T, jnp.bfloat16),               # (hidden, hidden)
        jnp.asarray(b2.reshape(hidden, 1), jnp.float32),
        jnp.asarray(w3.reshape(hidden, 1), jnp.float32),
        jnp.asarray(b3.reshape(1), jnp.float32),
    )


@functools.partial(jax.jit, static_argnames=("tb",))
def soft_q_forward(x, a, prepped, *, tb=2048):
    """x: (B, state_dim) f32, a: (B, action_dim) f32 -> (B, 1) f32 Q-values."""
    w1t, b1c, w2t, b2c, w3c, b3s = prepped
    B = x.shape[0]
    in_dim = x.shape[1] + a.shape[1]
    hidden, in_p = w1t.shape

    # Batch tile: as large as the batch allows, capped at `tb`.  For B > tb the
    # grid has >= 2 "parallel" steps, so both v7x TensorCores get work.
    tb_eff = min(tb, max(_round_up(B, 128), 128))
    n_tiles = pl.cdiv(B, tb_eff)
    b_pad = n_tiles * tb_eff

    # Fuse torch.cat into fc1: one feature-major bf16 activation matrix.
    # bf16 cast happens before padding/transposing (halves the copy bytes).
    xa = jnp.concatenate([x.astype(jnp.bfloat16), a.astype(jnp.bfloat16)],
                         axis=1)
    xa = jnp.pad(xa, ((0, b_pad - B), (0, in_p - in_dim)))
    xa_t = xa.T                                        # (in_p, b_pad)

    out = pl.pallas_call(
        soft_q_kernel,
        out_shape=jax.ShapeDtypeStruct((1, b_pad), jnp.float32),
        grid=(n_tiles,),
        in_specs=[
            pl.BlockSpec((in_p, tb_eff), lambda i: (0, i)),      # activations
            pl.BlockSpec((hidden, in_p), lambda i: (0, 0)),      # W1^T (resident)
            pl.BlockSpec((hidden, 1), lambda i: (0, 0)),         # b1 column
            pl.BlockSpec((hidden, hidden), lambda i: (0, 0)),    # W2^T (resident)
            pl.BlockSpec((hidden, 1), lambda i: (0, 0)),         # b2 column
            pl.BlockSpec((hidden, 1), lambda i: (0, 0)),         # w3 column
            pl.BlockSpec(memory_space=pltpu.MemorySpace.SMEM),   # b3 scalar
        ],
        out_specs=pl.BlockSpec((1, tb_eff), lambda i: (0, i)),   # lane-dense q
        compiler_params=pltpu.CompilerParams(
            dimension_semantics=("parallel",),
            vmem_limit_bytes=32 * 1024 * 1024),
    )(xa_t, w1t, b1c, w2t, b2c, w3c, b3s)

    # Padded batch columns carry garbage (bias paths) and are sliced off here;
    # never reduce over the padded output without masking.
    return out[0, :B].reshape(B, 1)


def init_params(key, state_dim, action_dim, hidden=256):
    """Deterministic init mirroring nn.Linear's U(-1/sqrt(fan_in), 1/sqrt(fan_in))."""
    def linear(k, fan_in, fan_out):
        kw, kb = jax.random.split(k)
        bound = 1.0 / jnp.sqrt(jnp.float32(fan_in))
        w = jax.random.uniform(kw, (fan_in, fan_out), jnp.float32, -bound, bound)
        b = jax.random.uniform(kb, (1, fan_out), jnp.float32, -bound, bound)
        return w, b

    k1, k2, k3 = jax.random.split(key, 3)
    w1, b1 = linear(k1, state_dim + action_dim, hidden)
    w2, b2 = linear(k2, hidden, hidden)
    w3, b3 = linear(k3, hidden, 1)
    return (w1, b1, w2, b2, w3, b3)


def soft_q_reference(x, a, params):
    # Mirrors the kernel's dtype flow (bf16 matmul operands, f32 accumulation).
    # NOTE: intentionally bf16, so not bit-identical to the fp32 PyTorch module.
    w1, b1, w2, b2, w3, b3 = params
    xa = jnp.concatenate([x, a], axis=1).astype(jnp.bfloat16)
    h = jnp.dot(xa, w1.astype(jnp.bfloat16),
                preferred_element_type=jnp.float32) + b1
    h = jnp.maximum(h, 0.0).astype(jnp.bfloat16)
    h = jnp.dot(h, w2.astype(jnp.bfloat16),
                preferred_element_type=jnp.float32) + b2
    h = jnp.maximum(h, 0.0)
    return jnp.dot(h, w3, preferred_element_type=jnp.float32) + b3


if __name__ == "__main__":
    key = jax.random.PRNGKey(0)
    k_params, k_x, k_a = jax.random.split(key, 3)

    state_dim, action_dim = 8, 4
    params = init_params(k_params, state_dim, action_dim)
    prepped = prepare_params(params)          # one-time, outside the hot path

    # Tiny demo batch (padded internally to a single 128-column tile).
    x = jax.random.normal(k_x, (2, state_dim), jnp.float32)
    a = jax.random.normal(k_a, (2, action_dim), jnp.float32)
    q = jax.block_until_ready(soft_q_forward(x, a, prepped))
    q_ref = soft_q_reference(x, a, params)
    assert q.shape == (2, 1)
    assert jnp.allclose(q, q_ref, atol=1e-2, rtol=1e-2), (q, q_ref)

    # Ragged batch with a small tile: exercises multiple grid steps + tail pad.
    xb = jax.random.normal(k_x, (515, state_dim), jnp.float32)
    ab = jax.random.normal(k_a, (515, action_dim), jnp.float32)
    qb = jax.block_until_ready(soft_q_forward(xb, ab, prepped, tb=128))
    qb_ref = soft_q_reference(xb, ab, params)
    assert qb.shape == (515, 1)
    assert jnp.allclose(qb, qb_ref, atol=1e-2, rtol=1e-2), (qb, qb_ref)

    print("KERNEL_OK")
</pallas_src>

<mosaic_0001>
module attributes {stable_mosaic.version = 11 : i64} {
  func.func @soft_q_kernel(%arg0: i32, %arg1: memref<16x128xbf16, #tpu.memory_space<vmem>>, %arg2: memref<256x16xbf16, #tpu.memory_space<vmem>>, %arg3: memref<256x1xf32, #tpu.memory_space<vmem>>, %arg4: memref<256x256xbf16, #tpu.memory_space<vmem>>, %arg5: memref<256x1xf32, #tpu.memory_space<vmem>>, %arg6: memref<256x1xf32, #tpu.memory_space<vmem>>, %arg7: memref<1xf32, #tpu.memory_space<smem>>, %arg8: memref<1x128xf32, #tpu.memory_space<vmem>>) attributes {dimension_semantics = [#tpu.dimension_semantics<parallel>], iteration_bounds = array<i64: 1>, scalar_prefetch = 0 : i64, scratch_operands = 0 : i64, tpu.core_type = #tpu.core_type<tc>, window_params = [{transform_indices = @transform_0, window_bounds = array<i64: 16, 128>}, {pipeline_mode = #tpu.pipeline_mode<synchronous>, transform_indices = @transform_1, window_bounds = array<i64: 256, 16>}, {pipeline_mode = #tpu.pipeline_mode<synchronous>, transform_indices = @transform_2, window_bounds = array<i64: 256, 1>}, {pipeline_mode = #tpu.pipeline_mode<synchronous>, transform_indices = @transform_3, window_bounds = array<i64: 256, 256>}, {pipeline_mode = #tpu.pipeline_mode<synchronous>, transform_indices = @transform_4, window_bounds = array<i64: 256, 1>}, {pipeline_mode = #tpu.pipeline_mode<synchronous>, transform_indices = @transform_5, window_bounds = array<i64: 256, 1>}, {transform_indices = @transform_6, window_bounds = array<i64: 1>}, {transform_indices = @transform_7, window_bounds = array<i64: 1, 128>}]} {
    %c0 = arith.constant 0 : index
    %c0_0 = arith.constant 0 : index
    %0 = vector.load %arg2[%c0, %c0_0] : memref<256x16xbf16, #tpu.memory_space<vmem>>, vector<256x16xbf16>
    %c0_1 = arith.constant 0 : index
    %c0_2 = arith.constant 0 : index
    %1 = vector.load %arg1[%c0_1, %c0_2] : memref<16x128xbf16, #tpu.memory_space<vmem>>, vector<16x128xbf16>
    %cst = arith.constant dense<0.000000e+00> : vector<256x128xf32>
    %2 = tpu.matmul %0, %1, %cst {dimension_numbers = #tpu.dot_dimension_numbers<[1], [0], [0], [1], [0, 0, 1, 1], [], []>} : vector<256x16xbf16>, vector<16x128xbf16>, vector<256x128xf32> -> vector<256x128xf32>
    %c0_3 = arith.constant 0 : index
    %c0_4 = arith.constant 0 : index
    %3 = vector.load %arg3[%c0_3, %c0_4] : memref<256x1xf32, #tpu.memory_space<vmem>>, vector<256x1xf32>
    %4 = vector.broadcast %3 : vector<256x1xf32> to vector<256x128xf32>
    %5 = arith.addf %2, %4 : vector<256x128xf32>
    %cst_5 = arith.constant 0.000000e+00 : f32
    %6 = vector.broadcast %cst_5 : f32 to vector<256x128xf32>
    %7 = arith.maximumf %5, %6 : vector<256x128xf32>
    %8 = arith.truncf %7 : vector<256x128xf32> to vector<256x128xbf16>
    %c0_6 = arith.constant 0 : index
    %c0_7 = arith.constant 0 : index
    %9 = vector.load %arg4[%c0_6, %c0_7] : memref<256x256xbf16, #tpu.memory_space<vmem>>, vector<256x256xbf16>
    %cst_8 = arith.constant dense<0.000000e+00> : vector<256x128xf32>
    %10 = tpu.matmul %9, %8, %cst_8 {dimension_numbers = #tpu.dot_dimension_numbers<[1], [0], [0], [1], [0, 0, 1, 1], [], []>} : vector<256x256xbf16>, vector<256x128xbf16>, vector<256x128xf32> -> vector<256x128xf32>
    %c0_9 = arith.constant 0 : index
    %c0_10 = arith.constant 0 : index
    %11 = vector.load %arg5[%c0_9, %c0_10] : memref<256x1xf32, #tpu.memory_space<vmem>>, vector<256x1xf32>
    %12 = vector.broadcast %11 : vector<256x1xf32> to vector<256x128xf32>
    %13 = arith.addf %10, %12 : vector<256x128xf32>
    %cst_11 = arith.constant 0.000000e+00 : f32
    %14 = vector.broadcast %cst_11 : f32 to vector<256x128xf32>
    %15 = arith.maximumf %13, %14 : vector<256x128xf32>
    %c0_12 = arith.constant 0 : index
    %c0_13 = arith.constant 0 : index
    %16 = vector.load %arg6[%c0_12, %c0_13] : memref<256x1xf32, #tpu.memory_space<vmem>>, vector<256x1xf32>
    %17 = vector.broadcast %16 : vector<256x1xf32> to vector<256x128xf32>
    %18 = arith.mulf %15, %17 : vector<256x128xf32>
    %cst_14 = arith.constant dense<0.000000e+00> : vector<128xf32>
    %19 = vector.multi_reduction <add>, %18, %cst_14 [0] : vector<256x128xf32> to vector<128xf32>
    %20 = vector.shape_cast %19 : vector<128xf32> to vector<1x128xf32>
    %c0_15 = arith.constant 0 : index
    %21 = memref.load %arg7[%c0_15] : memref<1xf32, #tpu.memory_space<smem>>
    %22 = vector.broadcast %21 : f32 to vector<1x128xf32>
    %23 = arith.addf %20, %22 : vector<1x128xf32>
    %c0_16 = arith.constant 0 : index
    %c0_17 = arith.constant 0 : index
    %24 = vector.load %arg8[%c0_16, %c0_17] : memref<1x128xf32, #tpu.memory_space<vmem>>, vector<1x128xf32>
    tpu.vector_store %arg8[%c0_16, %c0_17], %23 {strides = array<i32>} : memref<1x128xf32, #tpu.memory_space<vmem>>, vector<1x128xf32>,
    return
  }
  func.func @transform_0(%arg0: i32) -> (i32, i32) {
    %c0_i32 = arith.constant 0 : i32
    %c0_i32_0 = arith.constant 0 : i32
    return %c0_i32, %arg0 : i32, i32
  }
  func.func @transform_1(%arg0: i32) -> (i32, i32) {
    %c0_i32 = arith.constant 0 : i32
    %c0_i32_0 = arith.constant 0 : i32
    %c0_i32_1 = arith.constant 0 : i32
    return %c0_i32, %c0_i32_0 : i32, i32
  }
  func.func @transform_2(%arg0: i32) -> (i32, i32) {
    %c0_i32 = arith.constant 0 : i32
    %c0_i32_0 = arith.constant 0 : i32
    %c0_i32_1 = arith.constant 0 : i32
    return %c0_i32, %c0_i32_0 : i32, i32
  }
  func.func @transform_3(%arg0: i32) -> (i32, i32) {
    %c0_i32 = arith.constant 0 : i32
    %c0_i32_0 = arith.constant 0 : i32
    %c0_i32_1 = arith.constant 0 : i32
    return %c0_i32, %c0_i32_0 : i32, i32
  }
  func.func @transform_4(%arg0: i32) -> (i32, i32) {
    %c0_i32 = arith.constant 0 : i32
    %c0_i32_0 = arith.constant 0 : i32
    %c0_i32_1 = arith.constant 0 : i32
    return %c0_i32, %c0_i32_0 : i32, i32
  }
  func.func @transform_5(%arg0: i32) -> (i32, i32) {
    %c0_i32 = arith.constant 0 : i32
    %c0_i32_0 = arith.constant 0 : i32
    %c0_i32_1 = arith.constant 0 : i32
    return %c0_i32, %c0_i32_0 : i32, i32
  }
  func.func @transform_6(%arg0: i32) -> i32 {
    %c0_i32 = arith.constant 0 : i32
    %c0_i32_0 = arith.constant 0 : i32
    return %c0_i32 : i32
  }
  func.func @transform_7(%arg0: i32) -> (i32, i32) {
    %c0_i32 = arith.constant 0 : i32
    %c0_i32_0 = arith.constant 0 : i32
    return %c0_i32, %arg0 : i32, i32
  }
}

</mosaic_0001>

<bundles_post_ra>
// kernel: soft_q_forward.1
= control target key start
LH: loop header
LB: loop body
LE: loop exit
PB: predicated region body
PF: predicated region fallthrough
CT: control target
= control target key end

     0   :  { %v1756_v0 = vmov 0   ;;  %vm340_vm0 = vcmask 130048   ;;  %s2484_s2 = inlined_call_operand.vmem [shape: f32[256,1], index: 2, kind: input, shape index: {}]   ;;  %s2485_s0 = inlined_call_operand.vmem [shape: bf16[16,128], index: 0, kind: input, shape index: {}]   ;;  %s2486_s1 = inlined_call_operand.vmem [shape: bf16[256,16], index: 1, kind: input, shape index: {}]   ;;  %s2487_s4 = inlined_call_operand.vmem [shape: f32[256,1], index: 4, kind: input, shape index: {}]   ;;  %s2488_s5 = inlined_call_operand.vmem [shape: f32[256,1], index: 5, kind: input, shape index: {}]   ;;  %s2489_s3 = inlined_call_operand.vmem [shape: bf16[256,256], index: 3, kind: input, shape index: {}]   ;;  %s2490_s6 = inlined_call_operand.<no memory space> [shape: f32[1], index: 6, kind: input, shape index: {}]   ;;  %s2491_s7 = inlined_call_operand.vmem [shape: f32[1,128], index: 7, kind: output, shape index: {}]  }
   0x1   :  { %1690 = vset.pattern.permute.xlu1 %v1756_v0  ;;  %1689 = vset.pattern.permute.xlu0 %v1756_v0  ;;  %v78_v1 = vld [vmem:[%s2484_s2 + $0x80] sm:$0xff]  ;;  %v79_v4 = vld [vmem:[%s2484_s2 + $0x88] sm:$0xff]  ;;  %v80_v8 = vld [vmem:[%s2484_s2 + $0x90] sm:$0xff] }
   0x2   :  { %v62_v2 = vld [vmem:[%s2484_s2] sm:$0xff]  ;;  %176 = vperm.xlu0 %1689, %v78_v1   ;;  %v63_v5 = vld [vmem:[%s2484_s2 + $0x8] sm:$0xff]  ;;  %v81_v9 = vld [vmem:[%s2484_s2 + $0x98] sm:$0xff] }
   0x3   :  { %96 = vperm.xlu1 %1690, %v62_v2   ;;  %v1691_v3 = vld [vmem:[%s2485_s0] sm:$0xff]   ;;  %v1693_v7 = vld [vmem:[%s2486_s1 + $0x8] sm:$0xff]   ;;  %v1694_v10 = vld [vmem:[%s2486_s1 + $0x10] sm:$0xff]  }
   0x4   :  { %1638 = vmatprep.subr.bf16.mxu0 %v1691_v3  ;;  %v1692_v6 = vld [vmem:[%s2486_s1] sm:$0xff]   ;;  %v64_v11 = vld [vmem:[%s2484_s2 + $0x10] sm:$0xff]  ;;  %v65_v12 = vld [vmem:[%s2484_s2 + $0x18] sm:$0xff] }
   0x5   :  { %1639 = vmatpush3.bf16.msra.mxu0 %v1691_v3  ;;  %1640 = vmatprep.mubr.msk.bf16.mxu0 %vm340_vm0, %v1692_v6  ;;  %v1695_v13 = vld [vmem:[%s2486_s1 + $0x18] sm:$0xff]   ;;  %v1696_v14 = vld [vmem:[%s2486_s1 + $0x20] sm:$0xff]   ;;  %v83_v16 = vld [vmem:[%s2484_s2 + $0xa8] sm:$0xff] }
   0x6   :  { %181 = vperm.xlu0 %1689, %v79_v4   ;;  %v82_v15 = vld [vmem:[%s2484_s2 + $0xa0] sm:$0xff]  ;;  %v67_v18 = vld [vmem:[%s2484_s2 + $0x28] sm:$0xff]  ;;  %v1698_v20 = vld [vmem:[%s2486_s1 + $0x30] sm:$0xff]  }
   0x7   :  { %101 = vperm.xlu1 %1690, %v63_v5   ;;  %v66_v17 = vld [vmem:[%s2484_s2 + $0x20] sm:$0xff]  ;;  %v1697_v19 = vld [vmem:[%s2486_s1 + $0x28] sm:$0xff]   ;;  %v84_v21 = vld [vmem:[%s2484_s2 + $0xb0] sm:$0xff] }
   0x8   :  { %1641 = vmatmul.mubr.msk.bf16.vlgmr.msra.gmra.mrb[0].mxu0 %vm340_vm0, %v1693_v7  ;;  %v85_v22 = vld [vmem:[%s2484_s2 + $0xb8] sm:$0xff]  ;;  %v68_v23 = vld [vmem:[%s2484_s2 + $0x30] sm:$0xff]  ;;  %v1700_v26 = vld [vmem:[%s2486_s1 + $0x40] sm:$0xff]  }
   0x9   :  { %1644 = vmatprep.mubr.msk.bf16.mxu0 %vm340_vm0, %v1694_v10  ;;  %v69_v24 = vld [vmem:[%s2484_s2 + $0x38] sm:$0xff]  ;;  %v86_v27 = vld [vmem:[%s2484_s2 + $0xc0] sm:$0xff]  ;;  %v87_v28 = vld [vmem:[%s2484_s2 + $0xc8] sm:$0xff] }
   0xa   :  { %186 = vperm.xlu0 %1689, %v80_v8   ;;  %v1699_v25 = vld [vmem:[%s2486_s1 + $0x38] sm:$0xff]   ;;  %v70_v29 = vld [vmem:[%s2484_s2 + $0x40] sm:$0xff]  ;;  %v71_v30 = vld [vmem:[%s2484_s2 + $0x48] sm:$0xff] }
   0xb   :  { %191 = vperm.xlu1 %1690, %v81_v9   ;;  %v1701_v31 = vld [vmem:[%s2486_s1 + $0x48] sm:$0xff]   ;;  %v1702_v32 = vld [vmem:[%s2486_s1 + $0x50] sm:$0xff]   ;;  %v89_v34 = vld [vmem:[%s2484_s2 + $0xd8] sm:$0xff] }
   0xc   :  { %v88_v33 = vld [vmem:[%s2484_s2 + $0xd0] sm:$0xff]  ;;  %v73_v36 = vld [vmem:[%s2484_s2 + $0x58] sm:$0xff]  ;;  %v1704_v38 = vld [vmem:[%s2486_s1 + $0x60] sm:$0xff]  }
   0xd   :  { %v72_v35 = vld [vmem:[%s2484_s2 + $0x50] sm:$0xff]  ;;  %v1703_v37 = vld [vmem:[%s2486_s1 + $0x58] sm:$0xff]   ;;  %v90_v39 = vld [vmem:[%s2484_s2 + $0xe0] sm:$0xff] }
   0xe   :  { %106 = vperm.xlu0 %1689, %v64_v11   ;;  %v91_v40 = vld [vmem:[%s2484_s2 + $0xe8] sm:$0xff]  ;;  %v74_v41 = vld [vmem:[%s2484_s2 + $0x60] sm:$0xff]  ;;  %v1706_v44 = vld [vmem:[%s2486_s1 + $0x70] sm:$0xff]  }
   0xf   :  { %111 = vperm.xlu1 %1690, %v65_v12   ;;  %v75_v42 = vld [vmem:[%s2484_s2 + $0x68] sm:$0xff]  ;;  %v92_v45 = vld [vmem:[%s2484_s2 + $0xf0] sm:$0xff]  ;;  %v93_v46 = vld [vmem:[%s2484_s2 + $0xf8] sm:$0xff] }
  0x10   :  { %1645 = vmatmul.mubr.msk.bf16.gmra.mrb[4].mxu0 %vm340_vm0, %v1695_v13  ;;  %v1705_v43 = vld [vmem:[%s2486_s1 + $0x68] sm:$0xff]   ;;  %v76_v47 = vld [vmem:[%s2484_s2 + $0x70] sm:$0xff]  ;;  %v77_v48 = vld [vmem:[%s2484_s2 + $0x78] sm:$0xff] }
  0x11   :  { %1648 = vmatprep.mubr.msk.bf16.mxu0 %vm340_vm0, %v1696_v14  ;;  %v1707_v49 = vld [vmem:[%s2486_s1 + $0x78] sm:$0xff]   ;;  %v630_v50 = vld [vmem:[%s2487_s4] sm:$0xff]  ;;  %v631_v51 = vld [vmem:[%s2487_s4 + $0x8] sm:$0xff] }
  0x12   :  { %196 = vperm.xlu0 %1689, %v82_v15   ;;  %v632_v52 = vld [vmem:[%s2487_s4 + $0x10] sm:$0xff]  ;;  %v633_v53 = vld [vmem:[%s2487_s4 + $0x18] sm:$0xff]  ;;  %v634_v54 = vld [vmem:[%s2487_s4 + $0x20] sm:$0xff] }
  0x13   :  { %201 = vperm.xlu1 %1690, %v83_v16   ;;  %v635_v55 = vld [vmem:[%s2487_s4 + $0x28] sm:$0xff]  ;;  %v636_v56 = vld [vmem:[%s2487_s4 + $0x30] sm:$0xff]  ;;  %v637_v57 = vld [vmem:[%s2487_s4 + $0x38] sm:$0xff] }
  0x14   :  { %v638_v58 = vld [vmem:[%s2487_s4 + $0x40] sm:$0xff]  ;;  %v639_v59 = vld [vmem:[%s2487_s4 + $0x48] sm:$0xff]  ;;  %v640_v60 = vld [vmem:[%s2487_s4 + $0x50] sm:$0xff] }
  0x15   :  { %v641_v61 = vld [vmem:[%s2487_s4 + $0x58] sm:$0xff]  ;;  %v642_v62 = vld [vmem:[%s2487_s4 + $0x60] sm:$0xff]  ;;  %v643_v63 = vld [vmem:[%s2487_s4 + $0x68] sm:$0xff] }
  0x16   :  { %116 = vperm.xlu0 %1689, %v66_v17   ;;  %v644_v0 = vld [vmem:[%s2487_s4 + $0x70] sm:$0xff]  ;;  %v645_v1 = vld [vmem:[%s2487_s4 + $0x78] sm:$0xff]  ;;  %v646_v2 = vld [vmem:[%s2487_s4 + $0x80] sm:$0xff] }
  0x17   :  { %121 = vperm.xlu1 %1690, %v67_v18   ;;  %v647_v3 = vld [vmem:[%s2487_s4 + $0x88] sm:$0xff]  ;;  %v648_v4 = vld [vmem:[%s2487_s4 + $0x90] sm:$0xff]  ;;  %v649_v5 = vld [vmem:[%s2487_s4 + $0x98] sm:$0xff] }
  0x18   :  { %1649 = vmatmul.mubr.msk.bf16.gmra.mrb[8].mxu0 %vm340_vm0, %v1697_v19  ;;  %v650_v6 = vld [vmem:[%s2487_s4 + $0xa0] sm:$0xff]  ;;  %v651_v7 = vld [vmem:[%s2487_s4 + $0xa8] sm:$0xff]  ;;  %v652_v8 = vld [vmem:[%s2487_s4 + $0xb0] sm:$0xff] }
  0x19   :  { %1652 = vmatprep.mubr.msk.bf16.mxu0 %vm340_vm0, %v1698_v20  ;;  %v653_v9 = vld [vmem:[%s2487_s4 + $0xb8] sm:$0xff]  ;;  %v654_v10 = vld [vmem:[%s2487_s4 + $0xc0] sm:$0xff]  ;;  %v655_v11 = vld [vmem:[%s2487_s4 + $0xc8] sm:$0xff] }
  0x1a   :  { %206 = vperm.xlu0 %1689, %v84_v21   ;;  %v656_v12 = vld [vmem:[%s2487_s4 + $0xd0] sm:$0xff]  ;;  %v657_v13 = vld [vmem:[%s2487_s4 + $0xd8] sm:$0xff]  ;;  %v658_v14 = vld [vmem:[%s2487_s4 + $0xe0] sm:$0xff] }
  0x1b   :  { %211 = vperm.xlu1 %1690, %v85_v22   ;;  %v1175_v15 = vld [vmem:[%s2488_s5] sm:$0xff]  ;;  %v1176_v16 = vld [vmem:[%s2488_s5 + $0x8] sm:$0xff]  ;;  %v1177_v17 = vld [vmem:[%s2488_s5 + $0x10] sm:$0xff] }
  0x1c   :  { %v1178_v18 = vld [vmem:[%s2488_s5 + $0x18] sm:$0xff]  ;;  %v1179_v19 = vld [vmem:[%s2488_s5 + $0x20] sm:$0xff]  ;;  %v1180_v20 = vld [vmem:[%s2488_s5 + $0x28] sm:$0xff] }
  0x1d   :  { %v1181_v21 = vld [vmem:[%s2488_s5 + $0x30] sm:$0xff]  ;;  %v1182_v22 = vld [vmem:[%s2488_s5 + $0x38] sm:$0xff] }
  0x1e   :  { %126 = vperm.xlu0 %1689, %v68_v23   ;;  %v1183_v23 = vld [vmem:[%s2488_s5 + $0x40] sm:$0xff] }
  0x1f   :  { %131 = vperm.xlu1 %1690, %v69_v24   ;;  %v1184_v24 = vld [vmem:[%s2488_s5 + $0x48] sm:$0xff] }
  0x20   :  { %1653 = vmatmul.mubr.msk.bf16.gmra.mrb[12].mxu0 %vm340_vm0, %v1699_v25  ;;  %v1185_v25 = vld [vmem:[%s2488_s5 + $0x50] sm:$0xff] }
  0x21   :  { %1656 = vmatprep.mubr.msk.bf16.mxu0 %vm340_vm0, %v1700_v26  ;;  %v1186_v26 = vld [vmem:[%s2488_s5 + $0x58] sm:$0xff] }
  0x22   :  { %216 = vperm.xlu0 %1689, %v86_v27   ;;  %v1187_v27 = vld [vmem:[%s2488_s5 + $0x60] sm:$0xff] }
  0x23   :  { %221 = vperm.xlu1 %1690, %v87_v28   ;;  %v1188_v28 = vld [vmem:[%s2488_s5 + $0x68] sm:$0xff] }
  0x26   :  { %136 = vperm.xlu0 %1689, %v70_v29   ;;  %v1189_v29 = vld [vmem:[%s2488_s5 + $0x70] sm:$0xff] }
  0x27   :  { %141 = vperm.xlu1 %1690, %v71_v30   ;;  %v1190_v30 = vld [vmem:[%s2488_s5 + $0x78] sm:$0xff] }
  0x28   :  { %1657 = vmatmul.mubr.msk.bf16.gmra.mrb[16].mxu0 %vm340_vm0, %v1701_v31  ;;  %v1191_v31 = vld [vmem:[%s2488_s5 + $0x80] sm:$0xff] }
  0x29   :  { %1660 = vmatprep.mubr.msk.bf16.mxu0 %vm340_vm0, %v1702_v32 }
  0x2a   :  { %226 = vperm.xlu0 %1689, %v88_v33   ;;  %v1192_v33 = vld [vmem:[%s2488_s5 + $0x88] sm:$0xff] }
  0x2b   :  { %231 = vperm.xlu1 %1690, %v89_v34   ;;  %v1193_v34 = vld [vmem:[%s2488_s5 + $0x90] sm:$0xff] }
  0x2e   :  { %146 = vperm.xlu0 %1689, %v72_v35  }
  0x2f   :  { %151 = vperm.xlu1 %1690, %v73_v36   ;;  %v1194_v36 = vld [vmem:[%s2488_s5 + $0x98] sm:$0xff] }
  0x30   :  { %1661 = vmatmul.mubr.msk.bf16.gmra.mrb[20].mxu0 %vm340_vm0, %v1703_v37  ;;  %v1195_v37 = vld [vmem:[%s2488_s5 + $0xa0] sm:$0xff] }
  0x31   :  { %1664 = vmatprep.mubr.msk.bf16.mxu0 %vm340_vm0, %v1704_v38 }
  0x32   :  { %236 = vperm.xlu0 %1689, %v90_v39  }
  0x33   :  { %241 = vperm.xlu1 %1690, %v91_v40   ;;  %v1196_v40 = vld [vmem:[%s2488_s5 + $0xa8] sm:$0xff] }
  0x36   :  { %156 = vperm.xlu0 %1689, %v74_v41   ;;  %v1197_v41 = vld [vmem:[%s2488_s5 + $0xb0] sm:$0xff] }
  0x37   :  { %161 = vperm.xlu1 %1690, %v75_v42   ;;  %v1710_v42 = vld [vmem:[%s2489_s3 + $0x4] ss:$8 sps:$4 sm:$0xff]  }
  0x38   :  { %1665 = vmatmul.mubr.msk.bf16.gmra.mrb[24].mxu0 %vm340_vm0, %v1705_v43  ;;  %v1198_v43 = vld [vmem:[%s2488_s5 + $0xb8] sm:$0xff] }
  0x39   :  { %1668 = vmatprep.mubr.msk.bf16.mxu0 %vm340_vm0, %v1706_v44  ;;  %v1199_v44 = vld [vmem:[%s2488_s5 + $0xc0] sm:$0xff] }
  0x3a   :  { %246 = vperm.xlu0 %1689, %v92_v45   ;;  %v1713_v45 = vld [vmem:[%s2489_s3 + $0x54] ss:$8 sps:$4 sm:$0xff]  }
  0x3b   :  { %251 = vperm.xlu1 %1690, %v93_v46   ;;  %1054 = vmatprep.mubr.bf16.mxu1 %v1713_v45 }
  0x3e   :  { %166 = vperm.xlu0 %1689, %v76_v47  }
  0x3f   :  { %171 = vperm.xlu1 %1690, %v77_v48   ;;  %v1200_v48 = vld [vmem:[%s2488_s5 + $0xc8] sm:$0xff] }
  0x40   :  { %1669 = vmatmul.mubr.msk.bf16.gmra.mrb[28].mxu0 %vm340_vm0, %v1707_v49  ;;  %v1201_v49 = vld [vmem:[%s2488_s5 + $0xd0] sm:$0xff] }
  0x41   :  { %1014 = vmatprep.mubr.bf16.mxu0 %v1710_v42 }
  0x42   :  { %664 = vperm.xlu0 %1689, %v630_v50  }
  0x43   :  { %669 = vperm.xlu1 %1690, %v631_v51   ;;  %v659_v51 = vld [vmem:[%s2487_s4 + $0xe8] sm:$0xff] }
  0x46   :  { %674 = vperm.xlu0 %1689, %v632_v52   ;;  %v1202_v52 = vld [vmem:[%s2488_s5 + $0xd8] sm:$0xff] }
  0x47   :  { %679 = vperm.xlu1 %1690, %v633_v53  }
  0x4a   :  { %684 = vperm.xlu0 %1689, %v634_v54  }
  0x4b   :  { %689 = vperm.xlu1 %1690, %v635_v55   ;;  %v660_v55 = vld [vmem:[%s2487_s4 + $0xf0] sm:$0xff] }
  0x4e   :  { %694 = vperm.xlu0 %1689, %v636_v56   ;;  %v1203_v56 = vld [vmem:[%s2488_s5 + $0xe0] sm:$0xff] }
  0x4f   :  { %699 = vperm.xlu1 %1690, %v637_v57  }
  0x52   :  { %704 = vperm.xlu0 %1689, %v638_v58   ;;  %v661_v58 = vld [vmem:[%s2487_s4 + $0xf8] sm:$0xff] }
  0x53   :  { %709 = vperm.xlu1 %1690, %v639_v59   ;;  %v1204_v59 = vld [vmem:[%s2488_s5 + $0xe8] sm:$0xff] }
  0x56   :  { %714 = vperm.xlu0 %1689, %v640_v60  }
  0x57   :  { %719 = vperm.xlu1 %1690, %v641_v61  }
  0x5a   :  { %724 = vperm.xlu0 %1689, %v642_v62   ;;  %v1205_v62 = vld [vmem:[%s2488_s5 + $0xf0] sm:$0xff] }
  0x5b   :  { %729 = vperm.xlu1 %1690, %v643_v63   ;;  %v1206_v63 = vld [vmem:[%s2488_s5 + $0xf8] sm:$0xff] }
  0x5e   :  { %734 = vperm.xlu0 %1689, %v644_v0  }
  0x5f   :  { %739 = vperm.xlu1 %1690, %v645_v1  }
  0x62   :  { %744 = vperm.xlu0 %1689, %v646_v2  }
  0x63   :  { %749 = vperm.xlu1 %1690, %v647_v3  }
  0x66   :  { %754 = vperm.xlu0 %1689, %v648_v4  }
  0x67   :  { %759 = vperm.xlu1 %1690, %v649_v5  }
  0x6a   :  { %764 = vperm.xlu0 %1689, %v650_v6  }
  0x6b   :  { %769 = vperm.xlu1 %1690, %v651_v7  }
  0x6e   :  { %774 = vperm.xlu0 %1689, %v652_v8  }
  0x6f   :  { %779 = vperm.xlu1 %1690, %v653_v9  }
  0x72   :  { %784 = vperm.xlu0 %1689, %v654_v10  }
  0x73   :  { %789 = vperm.xlu1 %1690, %v655_v11  }
  0x76   :  { %794 = vperm.xlu0 %1689, %v656_v12  }
  0x77   :  { %799 = vperm.xlu1 %1690, %v657_v13  }
  0x7a   :  { %804 = vperm.xlu0 %1689, %v658_v14  }
  0x7b   :  { %1209 = vperm.xlu1 %1690, %v1175_v15  }
  0x7e   :  { %1214 = vperm.xlu0 %1689, %v1176_v16  }
  0x7f   :  { %1219 = vperm.xlu1 %1690, %v1177_v17  }
  0x81   :  { %v2098_v32 = vpop.permute.xlu0 %176 }
  0x82   :  { %1224 = vperm.xlu0 %1689, %v1178_v18   ;;  %v2106_v35 = vpop.permute.xlu1 %96 }
  0x83   :  { %1229 = vperm.xlu1 %1690, %v1179_v19  }
  0x85   :  { %v2114_v38 = vpop.permute.xlu0 %181 }
  0x86   :  { %1234 = vperm.xlu0 %1689, %v1180_v20   ;;  %v2116_v39 = vpop.permute.xlu1 %101 }
  0x87   :  { %1239 = vperm.xlu1 %1690, %v1181_v21  }
  0x89   :  { %v2136_v46 = vpop.permute.xlu0 %186 }
  0x8a   :  { %1244 = vperm.xlu0 %1689, %v1182_v22   ;;  %v2138_v47 = vpop.permute.xlu1 %191 }
  0x8b   :  { %1249 = vperm.xlu1 %1690, %v1183_v23  }
  0x8d   :  { %v107_v50 = vpop.permute.xlu0 %106 }
  0x8e   :  { %1254 = vperm.xlu0 %1689, %v1184_v24   ;;  %v112_v53 = vpop.permute.xlu1 %111 }
  0x8f   :  { %1259 = vperm.xlu1 %1690, %v1185_v25  }
  0x91   :  { %v2152_v54 = vpop.permute.xlu0 %196 }
  0x92   :  { %1264 = vperm.xlu0 %1689, %v1186_v26   ;;  %v2160_v57 = vpop.permute.xlu1 %201 }
  0x93   :  { %1269 = vperm.xlu1 %1690, %v1187_v27  }
  0x95   :  { %v117_v60 = vpop.permute.xlu0 %116 }
  0x96   :  { %1274 = vperm.xlu0 %1689, %v1188_v28   ;;  %v122_v61 = vpop.permute.xlu1 %121 }
  0x97   :  { %1279 = vperm.xlu1 %1690, %v1189_v29  }
  0x99   :  { %v2174_v0 = vpop.permute.xlu0 %206 }
  0x9a   :  { %1284 = vperm.xlu0 %1689, %v1190_v30   ;;  %v2176_v1 = vpop.permute.xlu1 %211 }
  0x9b   :  { %1289 = vperm.xlu1 %1690, %v1191_v31  }
  0x9d   :  { %v127_v2 = vpop.permute.xlu0 %126 }
  0x9e   :  { %1294 = vperm.xlu0 %1689, %v1192_v33   ;;  %v132_v3 = vpop.permute.xlu1 %131 }
  0x9f   :  { %1299 = vperm.xlu1 %1690, %v1193_v34  }
  0xa1   :  { %v2178_v4 = vpop.permute.xlu0 %216 }
  0xa2   :  { %1304 = vperm.xlu0 %1689, %v1194_v36   ;;  %v2180_v5 = vpop.permute.xlu1 %221 }
  0xa3   :  { %1309 = vperm.xlu1 %1690, %v1195_v37  }
  0xa5   :  { %v137_v6 = vpop.permute.xlu0 %136 }
  0xa6   :  { %1314 = vperm.xlu0 %1689, %v1196_v40   ;;  %v142_v7 = vpop.permute.xlu1 %141 }
  0xa7   :  { %1319 = vperm.xlu1 %1690, %v1197_v41  }
  0xa9   :  { %v2182_v8 = vpop.permute.xlu0 %226 }
  0xaa   :  { %1324 = vperm.xlu0 %1689, %v1198_v43   ;;  %v2184_v9 = vpop.permute.xlu1 %231 }
  0xab   :  { %1329 = vperm.xlu1 %1690, %v1199_v44  }
  0xad   :  { %v147_v11 = vpop.permute.xlu0 %146 }
  0xae   :  { %1334 = vperm.xlu0 %1689, %v1200_v48   ;;  %v152_v14 = vpop.permute.xlu1 %151 }
  0xaf   :  { %1339 = vperm.xlu1 %1690, %v1201_v49  }
  0xb1   :  { %v2188_v22 = vpop.permute.xlu0 %236 }
  0xb2   :  { %809 = vperm.xlu0 %1689, %v659_v51   ;;  %v2192_v27 = vpop.permute.xlu1 %241 }
  0xb3   :  { %1344 = vperm.xlu1 %1690, %v1202_v52  }
  0xb5   :  { %v157_v36 = vpop.permute.xlu0 %156 }
  0xb6   :  { %814 = vperm.xlu0 %1689, %v660_v55   ;;  %v162_v41 = vpop.permute.xlu1 %161 }
  0xb7   :  { %1349 = vperm.xlu1 %1690, %v1203_v56  }
  0xb9   :  { %v2200_v51 = vpop.permute.xlu0 %246 }
  0xba   :  { %819 = vperm.xlu0 %1689, %v661_v58   ;;  %v2202_v58 = vpop.permute.xlu1 %251 }
  0xbb   :  { %1354 = vperm.xlu1 %1690, %v1204_v59  }
  0xbe   :  { %1359 = vperm.xlu0 %1689, %v1205_v62  }
  0xbf   :  { %1364 = vperm.xlu1 %1690, %v1206_v63  }
  0xdb   :  { %v1642_v10 = vpop.f32.mrb[0].mxu0 }
  0xdc   :  { %v423_v12 = vpop.f32.mrb[1].mxu0  ;;  %v432_v13 = vadd.f32 %v1642_v10, %v107_v50  ;;  %v167_v10 = vpop.permute.xlu0 %166 }
  0xdd   :  { %v424_v15 = vadd.f32 %v423_v12, %v2106_v35  ;;  %v1643_v16 = vpop.f32.mrb[2].mxu0 }
  0xde   :  { %v435_v17 = vadd.f32 %v1643_v16, %v112_v53  ;;  %v426_v18 = vpop.f32.mrb[3].mxu0  ;;  %v552_v20 = vmax.f32 %v432_v13, 0.0 }
  0xdf   :  { %v427_v19 = vadd.f32 %v426_v18, %v2116_v39  ;;  %v550_v23 = vmax.f32 %v424_v15, 0.0  ;;  %v172_v15 = vpop.permute.xlu1 %171 }
  0xe0   :  { %v553_v21 = vmax.f32 %v435_v17, 0.0 }
  0xe1   :  { %v551_v24 = vmax.f32 %v427_v19, 0.0 }
  0xe2   :  { %v2190_v25 = vpack.c.bf16 %v553_v21, %v552_v20 }
  0xe3   :  { %v1646_v26 = vpop.f32.mrb[4].mxu0  ;;  %v2194_v28 = vpack.c.bf16 %v551_v24, %v550_v23 }
  0xe4   :  { %v439_v29 = vpop.f32.mrb[5].mxu0  ;;  %v448_v30 = vadd.f32 %v1646_v26, %v127_v2 }
  0xe5   :  { %v440_v31 = vadd.f32 %v439_v29, %v117_v60  ;;  %v1647_v33 = vpop.f32.mrb[6].mxu0 }
  0xe6   :  { %v451_v34 = vadd.f32 %v1647_v33, %v132_v3  ;;  %v442_v35 = vpop.f32.mrb[7].mxu0  ;;  %v556_v39 = vmax.f32 %v448_v30, 0.0 }
  0xe7   :  { %v443_v37 = vadd.f32 %v442_v35, %v122_v61  ;;  %v554_v42 = vmax.f32 %v440_v31, 0.0 }
  0xe8   :  { %v557_v40 = vmax.f32 %v451_v34, 0.0 }
  0xe9   :  { %v555_v43 = vmax.f32 %v443_v37, 0.0 }
  0xea   :  { %v2196_v44 = vpack.c.bf16 %v557_v40, %v556_v39 }
  0xeb   :  { %v1650_v45 = vpop.f32.mrb[8].mxu0  ;;  %v2198_v48 = vpack.c.bf16 %v555_v43, %v554_v42 }
  0xec   :  { %v455_v49 = vpop.f32.mrb[9].mxu0  ;;  %v464_v50 = vadd.f32 %v1650_v45, %v147_v11 }
  0xed   :  { %v456_v52 = vadd.f32 %v455_v49, %v137_v6  ;;  %v1651_v53 = vpop.f32.mrb[10].mxu0 }
  0xee   :  { %v467_v55 = vadd.f32 %v1651_v53, %v152_v14  ;;  %v458_v56 = vpop.f32.mrb[11].mxu0  ;;  %v560_v60 = vmax.f32 %v464_v50, 0.0 }
  0xef   :  { %v459_v59 = vadd.f32 %v458_v56, %v142_v7  ;;  %v558_v62 = vmax.f32 %v456_v52, 0.0 }
  0xf0   :  { %v561_v61 = vmax.f32 %v467_v55, 0.0 }
  0xf1   :  { %v559_v63 = vmax.f32 %v459_v59, 0.0 }
  0xf2   :  { %v2204_v2 = vpack.c.bf16 %v561_v61, %v560_v60 }
  0xf3   :  { %v1654_v3 = vpop.f32.mrb[12].mxu0  ;;  %v2206_v12 = vpack.c.bf16 %v559_v63, %v558_v62 }
  0xf4   :  { %v471_v11 = vpop.f32.mrb[13].mxu0  ;;  %v480_v13 = vadd.f32 %v1654_v3, %v167_v10 }
  0xf5   :  { %v472_v6 = vadd.f32 %v471_v11, %v157_v36  ;;  %v1655_v16 = vpop.f32.mrb[14].mxu0 }
  0xf6   :  { %v483_v14 = vadd.f32 %v1655_v16, %v172_v15  ;;  %v474_v17 = vpop.f32.mrb[15].mxu0  ;;  %v564_v19 = vmax.f32 %v480_v13, 0.0 }
  0xf7   :  { %v475_v18 = vadd.f32 %v474_v17, %v162_v41  ;;  %v562_v20 = vmax.f32 %v472_v6, 0.0 }
  0xf8   :  { %v565_v7 = vmax.f32 %v483_v14, 0.0 }
  0xf9   :  { %v563_v21 = vmax.f32 %v475_v18, 0.0 }
  0xfa   :  { %v2208_v23 = vpack.c.bf16 %v565_v7, %v564_v19 }
  0xfb   :  { %v1658_v24 = vpop.f32.mrb[16].mxu0  ;;  %v2210_v26 = vpack.c.bf16 %v563_v21, %v562_v20  ;;  %v1718_v20 = vld [vmem:[%s2489_s3 + $0x10] ss:$8 sps:$4 sm:$0xff]   ;;  %v1719_v21 = vld [vmem:[%s2489_s3 + $0x60] ss:$8 sps:$4 sm:$0xff]  }
  0xfc   :  { %v487_v29 = vpop.f32.mrb[17].mxu0  ;;  %v496_v30 = vadd.f32 %v1658_v24, %v2136_v46  ;;  %v1722_v24 = vld [vmem:[%s2489_s3 + $0x74] ss:$8 sps:$4 sm:$0xff]  }
  0xfd   :  { %v488_v31 = vadd.f32 %v487_v29, %v2098_v32  ;;  %v1659_v33 = vpop.f32.mrb[18].mxu0  ;;  %v1725_v29 = vld [vmem:[%s2489_s3 + $0x70] ss:$8 sps:$4 sm:$0xff]  }
  0xfe   :  { %v499_v34 = vadd.f32 %v1659_v33, %v2138_v47  ;;  %v490_v35 = vpop.f32.mrb[19].mxu0  ;;  %v568_v37 = vmax.f32 %v496_v30, 0.0  ;;  %v1726_v30 = vld [vmem:[%s2489_s3 + $0x34] ss:$8 sps:$4 sm:$0xff]   ;;  %v1730_v33 = vld [vmem:[%s2489_s3 + $0x30] ss:$8 sps:$4 sm:$0xff]  }
  0xff   :  { %v491_v36 = vadd.f32 %v490_v35, %v2114_v38  ;;  %v566_v40 = vmax.f32 %v488_v31, 0.0  ;;  %v1728_v31 = vld [vmem:[%s2489_s3 + $0x84] ss:$8 sps:$4 sm:$0xff]  }
 0x100   :  { %v569_v39 = vmax.f32 %v499_v34, 0.0  ;;  %v1731_v34 = vld [vmem:[%s2489_s3 + $0x80] ss:$8 sps:$4 sm:$0xff]   ;;  %v1732_v35 = vld [vmem:[%s2489_s3 + $0x44] ss:$8 sps:$4 sm:$0xff]  }
 0x101   :  { %v567_v41 = vmax.f32 %v491_v36, 0.0  ;;  %v1734_v36 = vld [vmem:[%s2489_s3 + $0x94] ss:$8 sps:$4 sm:$0xff]  }
 0x102   :  { %v591_v42 = vpack.c.bf16 %v569_v39, %v568_v37  ;;  %v1736_v37 = vld [vmem:[%s2489_s3 + $0x40] ss:$8 sps:$4 sm:$0xff]   ;;  %v1737_v39 = vld [vmem:[%s2489_s3 + $0x90] ss:$8 sps:$4 sm:$0xff]  }
 0x103   :  { %v1662_v43 = vpop.f32.mrb[20].mxu0  ;;  %v590_v45 = vpack.c.bf16 %v567_v41, %v566_v40  ;;  %v1738_v40 = vld [vmem:[%s2489_s3 + $0xa4] ss:$8 sps:$4 sm:$0xff]   ;;  %v1740_v41 = vld [vmem:[%s2489_s3 + $0xa0] ss:$8 sps:$4 sm:$0xff]  }
 0x104   :  { %v503_v49 = vpop.f32.mrb[21].mxu0  ;;  %v512_v50 = vadd.f32 %v1662_v43, %v2174_v0  ;;  %v1743_v43 = vld [vmem:[%s2489_s3 + $0xb0] ss:$8 sps:$4 sm:$0xff]  }
 0x105   :  { %v504_v46 = vadd.f32 %v503_v49, %v2152_v54  ;;  %v1663_v52 = vpop.f32.mrb[22].mxu0  ;;  %1526 = vmatprep.subr.bf16.mxu0 %v590_v45  ;;  %1672 = vmatprep.subr.bf16.mxu1 %v590_v45  ;;  %v1744_v45 = vld [vmem:[%s2489_s3 + $0xc4] ss:$8 sps:$4 sm:$0xff]   ;;  %v1746_v49 = vld [vmem:[%s2489_s3 + $0xc0] ss:$8 sps:$4 sm:$0xff]  }
 0x106   :  { %v515_v32 = vadd.f32 %v1663_v52, %v2176_v1  ;;  %v506_v47 = vpop.f32.mrb[23].mxu0  ;;  %1527 = vmatpush3.bf16.msra.mxu0 %v2194_v28  ;;  %1680 = vmatpush3.bf16.msra.mxu1 %v2194_v28  ;;  %v572_v53 = vmax.f32 %v512_v50, 0.0  ;;  %v1747_v50 = vld [vmem:[%s2489_s3 + $0xd4] ss:$8 sps:$4 sm:$0xff]   ;;  %v1750_v52 = vld [vmem:[%s2489_s3 + $0xe4] ss:$8 sps:$4 sm:$0xff]  }
 0x107   :  { %v507_v38 = vadd.f32 %v506_v47, %v2160_v57  ;;  %1528 = vmatprep.subr.bf16.mxu0 %v591_v42  ;;  %1673 = vmatprep.subr.bf16.mxu1 %v591_v42  ;;  %v570_v56 = vmax.f32 %v504_v46, 0.0  ;;  %v1741_v42 = vld [vmem:[%s2489_s3 + $0xb4] ss:$8 sps:$4 sm:$0xff]   ;;  %v1749_v46 = vld [vmem:[%s2489_s3 + $0xd0] ss:$8 sps:$4 sm:$0xff]  }
 0x108   :  { %v573_v55 = vmax.f32 %v515_v32, 0.0  ;;  %v1752_v32 = vld [vmem:[%s2489_s3 + $0xe0] ss:$8 sps:$4 sm:$0xff]   ;;  %v1753_v47 = vld [vmem:[%s2489_s3 + $0xf4] ss:$8 sps:$4 sm:$0xff]  }
 0x109   :  { %v571_v0 = vmax.f32 %v507_v38, 0.0  ;;  %v1755_v38 = vld [vmem:[%s2489_s3 + $0xf0] ss:$8 sps:$4 sm:$0xff]  }
 0x10a   :  { %v593_v59 = vpack.c.bf16 %v573_v55, %v572_v53  ;;  %1529 = vmatpush3.bf16.msra.mxu0 %v2190_v25  ;;  %1681 = vmatpush3.bf16.msra.mxu1 %v2190_v25  ;;  %v665_v53 = vpop.permute.xlu0 %664  ;;  %v670_v55 = vpop.permute.xlu1 %669 }
 0x10b   :  { %v1666_v54 = vpop.f32.mrb[24].mxu0  ;;  %v592_v1 = vpack.c.bf16 %v571_v0, %v570_v56 }
 0x10c   :  { %v519_v60 = vpop.f32.mrb[25].mxu0  ;;  %v528_v61 = vadd.f32 %v1666_v54, %v2182_v8 }
 0x10d   :  { %v520_v28 = vadd.f32 %v519_v60, %v2178_v4  ;;  %v1667_v62 = vpop.f32.mrb[26].mxu0  ;;  %1530 = vmatprep.subr.bf16.mxu0 %v592_v1  ;;  %1674 = vmatprep.subr.bf16.mxu1 %v592_v1 }
 0x10e   :  { %v531_v57 = vadd.f32 %v1667_v62, %v2184_v9  ;;  %v522_v63 = vpop.f32.mrb[27].mxu0  ;;  %1531 = vmatpush3.bf16.msra.mxu0 %v2198_v48  ;;  %1682 = vmatpush3.bf16.msra.mxu1 %v2198_v48  ;;  %v576_v25 = vmax.f32 %v528_v61, 0.0  ;;  %v2334_v56 = vpop.permute.xlu0 %674 }
 0x10f   :  { %v523_v3 = vadd.f32 %v522_v63, %v2180_v5  ;;  %1532 = vmatprep.subr.bf16.mxu0 %v593_v59  ;;  %1675 = vmatprep.subr.bf16.mxu1 %v593_v59  ;;  %v574_v11 = vmax.f32 %v520_v28, 0.0  ;;  %v2336_v0 = vpop.permute.xlu1 %679 }
 0x110   :  { %v577_v10 = vmax.f32 %v531_v57, 0.0 }
 0x111   :  { %v575_v8 = vmax.f32 %v523_v3, 0.0 }
 0x112   :  { %v595_v13 = vpack.c.bf16 %v577_v10, %v576_v25  ;;  %1533 = vmatpush3.bf16.msra.mxu0 %v2196_v44  ;;  %1683 = vmatpush3.bf16.msra.mxu1 %v2196_v44  ;;  %v2338_v59 = vpop.permute.xlu0 %684 }
 0x113   :  { %v1670_v4 = vpop.f32.mrb[28].mxu0  ;;  %v594_v9 = vpack.c.bf16 %v575_v8, %v574_v11  ;;  %v2340_v54 = vpop.permute.xlu1 %689 }
 0x114   :  { %v535_v15 = vpop.f32.mrb[29].mxu0  ;;  %v544_v6 = vadd.f32 %v1670_v4, %v2200_v51 }
 0x115   :  { %v536_v48 = vadd.f32 %v535_v15, %v2188_v22  ;;  %v1671_v16 = vpop.f32.mrb[30].mxu0  ;;  %1534 = vmatprep.subr.bf16.mxu0 %v594_v9  ;;  %1676 = vmatprep.subr.bf16.mxu1 %v594_v9 }
 0x116   :  { %v547_v5 = vadd.f32 %v1671_v16, %v2202_v58  ;;  %v538_v14 = vpop.f32.mrb[31].mxu0  ;;  %1535 = vmatpush3.bf16.msra.mxu0 %v2206_v12  ;;  %1684 = vmatpush3.bf16.msra.mxu1 %v2206_v12  ;;  %v580_v44 = vmax.f32 %v544_v6, 0.0  ;;  %v1711_v58 = vld [vmem:[%s2489_s3 + $0x50] ss:$8 sps:$4 sm:$0xff]   ;;  %v1716_v12 = vld [vmem:[%s2489_s3 + $0x64] ss:$8 sps:$4 sm:$0xff]   ;;  %v2342_v1 = vpop.permute.xlu0 %694 }
 0x117   :  { %v539_v17 = vadd.f32 %v538_v14, %v2192_v27  ;;  %1536 = vmatprep.subr.bf16.mxu0 %v595_v13  ;;  %1677 = vmatprep.subr.bf16.mxu1 %v595_v13  ;;  %v578_v19 = vmax.f32 %v536_v48, 0.0  ;;  %v1708_v27 = vld [vmem:[%s2489_s3] ss:$8 sps:$4 sm:$0xff]   ;;  %v2344_v60 = vpop.permute.xlu1 %699 }
 0x118   :  { %v581_v18 = vmax.f32 %v547_v5, 0.0 }
 0x119   :  { %v579_v51 = vmax.f32 %v539_v17, 0.0 }
 0x11a   :  { %v597_v7 = vpack.c.bf16 %v581_v18, %v580_v44  ;;  %1537 = vmatpush3.bf16.msra.mxu0 %v2204_v2  ;;  %1685 = vmatpush3.bf16.msra.mxu1 %v2204_v2  ;;  %v1714_v2 = vld [vmem:[%s2489_s3 + $0x14] ss:$8 sps:$4 sm:$0xff]   ;;  %v2346_v61 = vpop.permute.xlu0 %704 }
 0x11b   :  { %v596_v22 = vpack.c.bf16 %v579_v51, %v578_v19  ;;  %v2348_v28 = vpop.permute.xlu1 %709 }
 0x11d   :  { %1538 = vmatprep.subr.bf16.mxu0 %v596_v22  ;;  %1678 = vmatprep.subr.bf16.mxu1 %v596_v22 }
 0x11e   :  { %1539 = vmatpush3.bf16.msra.mxu0 %v2210_v26  ;;  %1686 = vmatpush3.bf16.msra.mxu1 %v2210_v26  ;;  %v1724_v26 = vld [vmem:[%s2489_s3 + $0x20] ss:$8 sps:$4 sm:$0xff]   ;;  %v2350_v62 = vpop.permute.xlu0 %714 }
 0x11f   :  { %1540 = vmatprep.subr.bf16.mxu0 %v597_v7  ;;  %1679 = vmatprep.subr.bf16.mxu1 %v597_v7  ;;  %v2352_v57 = vpop.permute.xlu1 %719 }
 0x122   :  { %1541 = vmatpush3.bf16.msra.mxu0 %v2208_v23  ;;  %1687 = vmatpush3.bf16.msra.mxu1 %v2208_v23  ;;  %v1720_v23 = vld [vmem:[%s2489_s3 + $0x24] ss:$8 sps:$4 sm:$0xff]   ;;  %v2354_v63 = vpop.permute.xlu0 %724 }
 0x123   :  { %v2356_v3 = vpop.permute.xlu1 %729 }
 0x125   :  { %1015 = vmatmul.mubr.bf16.vlgmr.msra.gmra.mrb[32].mxu0 %v1708_v27  ;;  %1055 = vmatmul.mubr.bf16.vlgmr.msra.gmra.mrb[0].mxu1 %v1711_v58 }
 0x126   :  { %1022 = vmatprep.mubr.bf16.mxu0 %v1714_v2  ;;  %1062 = vmatprep.mubr.bf16.mxu1 %v1716_v12  ;;  %v2358_v25 = vpop.permute.xlu0 %734 }
 0x127   :  { %v2360_v10 = vpop.permute.xlu1 %739 }
 0x12a   :  { %v2362_v11 = vpop.permute.xlu0 %744 }
 0x12b   :  { %v2364_v8 = vpop.permute.xlu1 %749 }
 0x12d   :  { %1023 = vmatmul.mubr.bf16.gmra.mrb[36].mxu0 %v1718_v20  ;;  %1063 = vmatmul.mubr.bf16.gmra.mrb[4].mxu1 %v1719_v21 }
 0x12e   :  { %1030 = vmatprep.mubr.bf16.mxu0 %v1720_v23  ;;  %1070 = vmatprep.mubr.bf16.mxu1 %v1722_v24  ;;  %v2366_v13 = vpop.permute.xlu0 %754 }
 0x12f   :  { %v2368_v4 = vpop.permute.xlu1 %759 }
 0x132   :  { %v2370_v9 = vpop.permute.xlu0 %764 }
 0x133   :  { %v2372_v15 = vpop.permute.xlu1 %769 }
 0x135   :  { %1031 = vmatmul.mubr.bf16.gmra.mrb[40].mxu0 %v1724_v26  ;;  %1071 = vmatmul.mubr.bf16.gmra.mrb[8].mxu1 %v1725_v29 }
 0x136   :  { %1038 = vmatprep.mubr.bf16.mxu0 %v1726_v30  ;;  %1078 = vmatprep.mubr.bf16.mxu1 %v1728_v31  ;;  %v2374_v6 = vpop.permute.xlu0 %774 }
 0x137   :  { %v2376_v48 = vpop.permute.xlu1 %779 }
 0x13a   :  { %v2378_v16 = vpop.permute.xlu0 %784 }
 0x13b   :  { %v2380_v5 = vpop.permute.xlu1 %789 }
 0x13d   :  { %1039 = vmatmul.mubr.bf16.gmra.mrb[44].mxu0 %v1730_v33  ;;  %1079 = vmatmul.mubr.bf16.gmra.mrb[12].mxu1 %v1731_v34 }
 0x13e   :  { %1046 = vmatprep.mubr.bf16.mxu0 %v1732_v35  ;;  %1086 = vmatprep.mubr.bf16.mxu1 %v1734_v36  ;;  %v2382_v14 = vpop.permute.xlu0 %794 }
 0x13f   :  { %v2384_v17 = vpop.permute.xlu1 %799 }
 0x142   :  { %v2386_v44 = vpop.permute.xlu0 %804 }
 0x143   :  { %v1210_v18 = vpop.permute.xlu1 %1209 }
 0x145   :  { %1047 = vmatmul.mubr.bf16.gmra.mrb[48].mxu0 %v1736_v37  ;;  %1087 = vmatmul.mubr.bf16.gmra.mrb[16].mxu1 %v1737_v39 }
 0x146   :  { %1094 = vmatprep.mubr.bf16.mxu1 %v1738_v40  ;;  %v1215_v19 = vpop.permute.xlu0 %1214 }
 0x147   :  { %v1220_v51 = vpop.permute.xlu1 %1219 }
 0x14a   :  { %v1225_v7 = vpop.permute.xlu0 %1224 }
 0x14b   :  { %v2388_v22 = vpop.permute.xlu1 %1229 }
 0x14d   :  { %1095 = vmatmul.mubr.bf16.gmra.mrb[20].mxu1 %v1740_v41 }
 0x14e   :  { %1102 = vmatprep.mubr.bf16.mxu1 %v1741_v42  ;;  %v2390_v27 = vpop.permute.xlu0 %1234 }
 0x14f   :  { %v2392_v58 = vpop.permute.xlu1 %1239 }
 0x152   :  { %v2394_v2 = vpop.permute.xlu0 %1244 }
 0x153   :  { %v2396_v12 = vpop.permute.xlu1 %1249 }
 0x155   :  { %1103 = vmatmul.mubr.bf16.gmra.mrb[24].mxu1 %v1743_v43 }
 0x156   :  { %1110 = vmatprep.mubr.bf16.mxu1 %v1744_v45  ;;  %v2402_v41 = vpop.permute.xlu0 %1254 }
 0x157   :  { %v2404_v42 = vpop.permute.xlu1 %1259 }
 0x15d   :  { %1111 = vmatmul.mubr.bf16.gmra.mrb[28].mxu1 %v1746_v49 }
 0x15e   :  { %1118 = vmatprep.mubr.bf16.mxu1 %v1747_v50 }
 0x165   :  { %1119 = vmatmul.mubr.bf16.gmra.mrb[32].mxu1 %v1749_v46 }
 0x166   :  { %1126 = vmatprep.mubr.bf16.mxu1 %v1750_v52 }
 0x16d   :  { %1127 = vmatmul.mubr.bf16.gmra.mrb[36].mxu1 %v1752_v32 }
 0x16e   :  { %1134 = vmatprep.mubr.bf16.mxu1 %v1753_v47 }
 0x175   :  { %1135 = vmatmul.mubr.bf16.gmra.mrb[40].mxu1 %v1755_v38 }
 0x1f8   :  { %v1542_v20 = vpop.f32.mrb[32].mxu0  ;;  %v1572_v21 = vpop.f32.mrb[0].mxu1 }
 0x1f9   :  { %v1543_v23 = vpop.f32.mrb[33].mxu0  ;;  %v1573_v24 = vpop.f32.mrb[1].mxu1 }
 0x1fa   :  { %v1544_v26 = vadd.f32 %v1543_v23, %v1542_v20  ;;  %v2398_v29 = vadd.f32 %v1573_v24, %v1572_v21  ;;  %v1545_v30 = vpop.f32.mrb[34].mxu0  ;;  %v1575_v31 = vpop.f32.mrb[2].mxu1 }
 0x1fb   :  { %v1546_v33 = vpop.f32.mrb[35].mxu0  ;;  %v1576_v34 = vpop.f32.mrb[3].mxu1 }
 0x1fc   :  { %v1017_v35 = vadd.f32 %v1544_v26, %v665_v53  ;;  %v1547_v36 = vadd.f32 %v1546_v33, %v1545_v30  ;;  %v2400_v37 = vadd.f32 %v1576_v34, %v1575_v31  ;;  %v2412_v34 = vpop.permute.xlu0 %1264 }
 0x1fe   :  { %v1143_v39 = vmax.f32 %v1017_v35, 0.0  ;;  %v1020_v40 = vadd.f32 %v1547_v36, %v670_v55 }
 0x200   :  { %v1144_v43 = vmax.f32 %v1020_v40, 0.0  ;;  %v1548_v45 = vpop.f32.mrb[36].mxu0  ;;  %v1578_v49 = vpop.f32.mrb[4].mxu1  ;;  %v1367_v52 = vmul.f32 %v1210_v18, %v1143_v39 }
 0x201   :  { %v1549_v50 = vpop.f32.mrb[37].mxu0  ;;  %v1579_v46 = vpop.f32.mrb[5].mxu1 }
 0x202   :  { %v1368_v32 = vmul.f32 %v1215_v19, %v1144_v43  ;;  %v1550_v47 = vadd.f32 %v1549_v50, %v1548_v45  ;;  %v2406_v38 = vadd.f32 %v1579_v46, %v1578_v49  ;;  %v1551_v53 = vpop.f32.mrb[38].mxu0  ;;  %v1581_v20 = vpop.f32.mrb[6].mxu1 }
 0x203   :  { %v1552_v21 = vpop.f32.mrb[39].mxu0  ;;  %v1582_v23 = vpop.f32.mrb[7].mxu1 }
 0x204   :  { %v1399_v24 = vadd.f32 %v1368_v32, %v1367_v52  ;;  %v1025_v55 = vadd.f32 %v1550_v47, %v2334_v56  ;;  %v1553_v26 = vadd.f32 %v1552_v21, %v1551_v53  ;;  %v2409_v30 = vadd.f32 %v1582_v23, %v1581_v20  ;;  %v2414_v18 = vpop.permute.xlu1 %1269 }
 0x206   :  { %v1145_v31 = vmax.f32 %v1025_v55, 0.0  ;;  %v1028_v33 = vadd.f32 %v1553_v26, %v2336_v0  ;;  %v2422_v55 = vpop.permute.xlu0 %1274 }
 0x208   :  { %v1369_v19 = vmul.f32 %v1220_v51, %v1145_v31  ;;  %v1146_v35 = vmax.f32 %v1028_v33, 0.0  ;;  %v1554_v36 = vpop.f32.mrb[40].mxu0  ;;  %v1584_v39 = vpop.f32.mrb[8].mxu1 }
 0x209   :  { %v1555_v40 = vpop.f32.mrb[41].mxu0  ;;  %v1585_v43 = vpop.f32.mrb[9].mxu1 }
 0x20a   :  { %v1400_v45 = vadd.f32 %v1399_v24, %v1369_v19  ;;  %v1370_v49 = vmul.f32 %v1225_v7, %v1146_v35  ;;  %v1556_v50 = vadd.f32 %v1555_v40, %v1554_v36  ;;  %v2416_v56 = vadd.f32 %v1585_v43, %v1584_v39  ;;  %v1557_v46 = vpop.f32.mrb[42].mxu0  ;;  %v1587_v52 = vpop.f32.mrb[10].mxu1 }
 0x20b   :  { %v1558_v32 = vpop.f32.mrb[43].mxu0  ;;  %v1588_v47 = vpop.f32.mrb[11].mxu1 }
 0x20c   :  { %v1401_v0 = vadd.f32 %v1400_v45, %v1370_v49  ;;  %v1033_v53 = vadd.f32 %v1556_v50, %v2338_v59  ;;  %v1559_v20 = vadd.f32 %v1558_v32, %v1557_v46  ;;  %v2419_v21 = vadd.f32 %v1588_v47, %v1587_v52  ;;  %v2424_v24 = vpop.permute.xlu1 %1279 }
 0x20e   :  { %v1147_v51 = vmax.f32 %v1033_v53, 0.0  ;;  %v1036_v23 = vadd.f32 %v1559_v20, %v2340_v54  ;;  %v2432_v53 = vpop.permute.xlu0 %1284 }
 0x210   :  { %v1371_v7 = vmul.f32 %v2388_v22, %v1147_v51  ;;  %v1148_v26 = vmax.f32 %v1036_v23, 0.0  ;;  %v1560_v31 = vpop.f32.mrb[44].mxu0  ;;  %v1590_v33 = vpop.f32.mrb[12].mxu1 }
 0x211   :  { %v1561_v19 = vpop.f32.mrb[45].mxu0  ;;  %v1591_v35 = vpop.f32.mrb[13].mxu1 }
 0x212   :  { %v1402_v36 = vadd.f32 %v1401_v0, %v1371_v7  ;;  %v1372_v59 = vmul.f32 %v2390_v27, %v1148_v26  ;;  %v1562_v39 = vadd.f32 %v1561_v19, %v1560_v31  ;;  %v2428_v40 = vadd.f32 %v1591_v35, %v1590_v33  ;;  %v1563_v43 = vpop.f32.mrb[46].mxu0  ;;  %v1593_v45 = vpop.f32.mrb[14].mxu1 }
 0x213   :  { %v1564_v54 = vpop.f32.mrb[47].mxu0  ;;  %v1594_v49 = vpop.f32.mrb[15].mxu1 }
 0x214   :  { %v1403_v50 = vadd.f32 %v1402_v36, %v1372_v59  ;;  %v1041_v46 = vadd.f32 %v1562_v39, %v2342_v1  ;;  %v1565_v52 = vadd.f32 %v1564_v54, %v1563_v43  ;;  %v1595_v22 = vadd.f32 %v1594_v49, %v1593_v45  ;;  %v2434_v0 = vpop.permute.xlu1 %1289  ;;  %v1295_v49 = vpop.permute.xlu0 %1294 }
 0x215   :  { %v1057_v39 = vadd.f32 %v2398_v29, %v2350_v62 }
 0x216   :  { %v1149_v32 = vmax.f32 %v1041_v46, 0.0  ;;  %v1044_v47 = vadd.f32 %v1565_v52, %v2344_v60 }
 0x218   :  { %v1373_v27 = vmul.f32 %v2392_v58, %v1149_v32  ;;  %v1150_v20 = vmax.f32 %v1044_v47, 0.0  ;;  %v1566_v51 = vpop.f32.mrb[48].mxu0  ;;  %v1596_v23 = vpop.f32.mrb[16].mxu1  ;;  %v1153_v32 = vmax.f32 %v1057_v39, 0.0  ;;  %v1065_v47 = vadd.f32 %v2406_v38, %v2354_v63 }
 0x219   :  { %v1567_v7 = vpop.f32.mrb[49].mxu0  ;;  %v1597_v26 = vpop.f32.mrb[17].mxu1 }
 0x21a   :  { %v1404_v31 = vadd.f32 %v1403_v50, %v1373_v27  ;;  %v1374_v33 = vmul.f32 %v2394_v2, %v1150_v20  ;;  %v1568_v1 = vadd.f32 %v1567_v7, %v1566_v51  ;;  %v1598_v19 = vadd.f32 %v1597_v26, %v1596_v23  ;;  %v1569_v35 = vpop.f32.mrb[50].mxu0  ;;  %v1599_v36 = vpop.f32.mrb[18].mxu1 }
 0x21b   :  { %v1570_v59 = vpop.f32.mrb[51].mxu0  ;;  %v1600_v60 = vpop.f32.mrb[19].mxu1  ;;  %v1060_v50 = vadd.f32 %v2400_v37, %v2352_v57  ;;  %v1073_v7 = vadd.f32 %v2416_v56, %v2358_v25  ;;  %v1377_v63 = vmul.f32 %v2404_v42, %v1153_v32  ;;  %v1081_v25 = vadd.f32 %v2428_v40, %v2362_v11 }
 0x21c   :  { %v1405_v43 = vadd.f32 %v1404_v31, %v1374_v33  ;;  %v1049_v58 = vadd.f32 %v1568_v1, %v2346_v61  ;;  %v1571_v45 = vadd.f32 %v1570_v59, %v1569_v35  ;;  %v1601_v54 = vadd.f32 %v1600_v60, %v1599_v36  ;;  %v2444_v52 = vpop.permute.xlu1 %1299  ;;  %v1305_v31 = vpop.permute.xlu0 %1304 }
 0x21d   :  { %v1068_v61 = vadd.f32 %v2409_v30, %v2356_v3  ;;  %v1154_v51 = vmax.f32 %v1060_v50, 0.0  ;;  %v1076_v30 = vadd.f32 %v2419_v21, %v2360_v10  ;;  %v1157_v36 = vmax.f32 %v1073_v7, 0.0 }
 0x21e   :  { %v1151_v46 = vmax.f32 %v1049_v58, 0.0  ;;  %v1052_v2 = vadd.f32 %v1571_v45, %v2348_v28  ;;  %v1084_v45 = vadd.f32 %v1595_v22, %v2364_v8  ;;  %v1089_v32 = vadd.f32 %v1598_v19, %v2366_v13 }
 0x21f   :  { %v1156_v35 = vmax.f32 %v1068_v61, 0.0  ;;  %v1378_v3 = vmul.f32 %v2412_v34, %v1154_v51  ;;  %v1158_v58 = vmax.f32 %v1076_v30, 0.0  ;;  %v1381_v21 = vmul.f32 %v2424_v24, %v1157_v36 }
 0x220   :  { %v1375_v62 = vmul.f32 %v2396_v12, %v1151_v46  ;;  %v1152_v29 = vmax.f32 %v1052_v2, 0.0  ;;  %v1602_v27 = vpop.f32.mrb[20].mxu1  ;;  %v1155_v12 = vmax.f32 %v1065_v47, 0.0  ;;  %v1310_v1 = vpop.permute.xlu1 %1309  ;;  %v1161_v22 = vmax.f32 %v1089_v32, 0.0 }
 0x221   :  { %v1603_v20 = vpop.f32.mrb[21].mxu1  ;;  %v1380_v42 = vmul.f32 %v2422_v55, %v1156_v35  ;;  %v1382_v47 = vmul.f32 %v2432_v53, %v1158_v58  ;;  %v1160_v55 = vmax.f32 %v1084_v45, 0.0 }
 0x222   :  { %v1406_v23 = vadd.f32 %v1405_v43, %v1375_v62  ;;  %v1376_v57 = vmul.f32 %v2402_v41, %v1152_v29  ;;  %v1604_v37 = vadd.f32 %v1603_v20, %v1602_v27  ;;  %v1605_v28 = vpop.f32.mrb[22].mxu1  ;;  %v1379_v59 = vmul.f32 %v2414_v18, %v1155_v12  ;;  %v1315_v43 = vpop.permute.xlu0 %1314 }
 0x223   :  { %v1606_v26 = vpop.f32.mrb[23].mxu1  ;;  %v1159_v18 = vmax.f32 %v1081_v25, 0.0  ;;  %v1092_v62 = vadd.f32 %v1601_v54, %v2368_v4  ;;  %v1384_v19 = vmul.f32 %v1295_v49, %v1160_v55 }
 0x224   :  { %v1407_v38 = vadd.f32 %v1406_v23, %v1376_v57  ;;  %v1607_v33 = vadd.f32 %v1606_v26, %v1605_v28  ;;  %v1320_v10 = vpop.permute.xlu1 %1319  ;;  %v1097_v20 = vadd.f32 %v1604_v37, %v2370_v9  ;;  %v1385_v26 = vmul.f32 %v2444_v52, %v1161_v22 }
 0x225   :  { %v1383_v8 = vmul.f32 %v2434_v0, %v1159_v18  ;;  %v1162_v57 = vmax.f32 %v1092_v62, 0.0 }
 0x226   :  { %v1408_v41 = vadd.f32 %v1407_v38, %v1377_v63  ;;  %v1325_v27 = vpop.permute.xlu0 %1324  ;;  %v1100_v23 = vadd.f32 %v1607_v33, %v2372_v15  ;;  %v1163_v63 = vmax.f32 %v1097_v20, 0.0 }
 0x227   :  { %v1386_v37 = vmul.f32 %v1305_v31, %v1162_v57 }
 0x228   :  { %v1409_v56 = vadd.f32 %v1408_v41, %v1378_v3  ;;  %v1608_v60 = vpop.f32.mrb[24].mxu1  ;;  %v1330_v51 = vpop.permute.xlu1 %1329  ;;  %v1164_v38 = vmax.f32 %v1100_v23, 0.0  ;;  %v1387_v30 = vmul.f32 %v1310_v1, %v1163_v63 }
 0x229   :  { %v1609_v39 = vpop.f32.mrb[25].mxu1 }
 0x22a   :  { %v1410_v34 = vadd.f32 %v1409_v56, %v1379_v59  ;;  %v1610_v50 = vadd.f32 %v1609_v39, %v1608_v60  ;;  %v1611_v46 = vpop.f32.mrb[26].mxu1  ;;  %v1335_v9 = vpop.permute.xlu0 %1334 }
 0x22b   :  { %v1612_v2 = vpop.f32.mrb[27].mxu1 }
 0x22c   :  { %v1411_v11 = vadd.f32 %v1410_v34, %v1380_v42  ;;  %v1613_v40 = vadd.f32 %v1612_v2, %v1611_v46  ;;  %v1105_v4 = vadd.f32 %v1610_v50, %v2374_v6  ;;  %v1340_v33 = vpop.permute.xlu1 %1339  ;;  %v1388_v6 = vmul.f32 %v1315_v43, %v1164_v38 }
 0x22e   :  { %v1412_v29 = vadd.f32 %v1411_v11, %v1381_v21  ;;  %v1108_v15 = vadd.f32 %v1613_v40, %v2376_v48  ;;  %v1165_v49 = vmax.f32 %v1105_v4, 0.0  ;;  %v810_v58 = vpop.permute.xlu0 %809 }
 0x230   :  { %v1413_v61 = vadd.f32 %v1412_v29, %v1382_v47  ;;  %v1614_v24 = vpop.f32.mrb[28].mxu1  ;;  %v1166_v52 = vmax.f32 %v1108_v15, 0.0  ;;  %v1389_v39 = vmul.f32 %v1320_v10, %v1165_v49  ;;  %v1345_v1 = vpop.permute.xlu1 %1344 }
 0x231   :  { %v1615_v13 = vpop.f32.mrb[29].mxu1 }
 0x232   :  { %v1414_v28 = vadd.f32 %v1413_v61, %v1383_v8  ;;  %v1616_v53 = vadd.f32 %v1615_v13, %v1614_v24  ;;  %v1617_v7 = vpop.f32.mrb[30].mxu1  ;;  %v815_v40 = vpop.permute.xlu0 %814 }
 0x233   :  { %v1618_v54 = vpop.f32.mrb[31].mxu1 }
 0x234   :  { %v1415_v0 = vadd.f32 %v1414_v28, %v1384_v19  ;;  %v1619_v12 = vadd.f32 %v1618_v54, %v1617_v7  ;;  %v1113_v41 = vadd.f32 %v1616_v53, %v2378_v16  ;;  %v1390_v16 = vmul.f32 %v1325_v27, %v1166_v52  ;;  %v1350_v8 = vpop.permute.xlu1 %1349 }
 0x236   :  { %v1416_v35 = vadd.f32 %v1415_v0, %v1385_v26  ;;  %v1116_v56 = vadd.f32 %v1619_v12, %v2380_v5  ;;  %v1167_v48 = vmax.f32 %v1113_v41, 0.0  ;;  %v820_v13 = vpop.permute.xlu0 %819 }
 0x238   :  { %v1417_v3 = vadd.f32 %v1416_v35, %v1386_v37  ;;  %v1620_v36 = vpop.f32.mrb[32].mxu1  ;;  %v1168_v21 = vmax.f32 %v1116_v56, 0.0  ;;  %v1391_v18 = vmul.f32 %v1330_v51, %v1167_v48  ;;  %v1355_v7 = vpop.permute.xlu1 %1354 }
 0x239   :  { %v1621_v59 = vpop.f32.mrb[33].mxu1 }
 0x23a   :  { %v1418_v25 = vadd.f32 %v1417_v3, %v1387_v30  ;;  %v1622_v60 = vadd.f32 %v1621_v59, %v1620_v36  ;;  %v1623_v42 = vpop.f32.mrb[34].mxu1  ;;  %v1392_v47 = vmul.f32 %v1335_v9, %v1168_v21  ;;  %v1360_v15 = vpop.permute.xlu0 %1359 }
 0x23b   :  { %v1624_v31 = vpop.f32.mrb[35].mxu1 }
 0x23c   :  { %v1419_v45 = vadd.f32 %v1418_v25, %v1388_v6  ;;  %v1121_v34 = vadd.f32 %v1622_v60, %v2382_v14  ;;  %v1625_v50 = vadd.f32 %v1624_v31, %v1623_v42  ;;  %v1365_v3 = vpop.permute.xlu1 %1364  ;;  %v1437_v60 = vstv %s2490_s6 }
 0x23e   :  { %v1420_v46 = vadd.f32 %v1419_v45, %v1389_v39  ;;  %v1124_v43 = vadd.f32 %v1625_v50, %v2384_v17  ;;  %v1169_v32 = vmax.f32 %v1121_v34, 0.0 }
 0x240   :  { %v1421_v2 = vadd.f32 %v1420_v46, %v1390_v16  ;;  %v1626_v5 = vpop.f32.mrb[36].mxu1  ;;  %v1170_v55 = vmax.f32 %v1124_v43, 0.0  ;;  %v1393_v61 = vmul.f32 %v1340_v33, %v1169_v32 }
 0x241   :  { %v1627_v11 = vpop.f32.mrb[37].mxu1 }
 0x242   :  { %v1422_v10 = vadd.f32 %v1421_v2, %v1391_v18  ;;  %v1628_v62 = vadd.f32 %v1627_v11, %v1626_v5  ;;  %v1629_v29 = vpop.f32.mrb[38].mxu1  ;;  %v1394_v17 = vmul.f32 %v1345_v1, %v1170_v55 }
 0x243   :  { %v1630_v14 = vpop.f32.mrb[39].mxu1 }
 0x244   :  { %v1423_v22 = vadd.f32 %v1422_v10, %v1392_v47  ;;  %v1129_v27 = vadd.f32 %v1628_v62, %v2386_v44  ;;  %v1631_v20 = vadd.f32 %v1630_v14, %v1629_v29 }
 0x246   :  { %v1424_v24 = vadd.f32 %v1423_v22, %v1393_v61  ;;  %v1171_v23 = vmax.f32 %v1129_v27, 0.0  ;;  %v1132_v51 = vadd.f32 %v1631_v20, %v810_v58 }
 0x248   :  { %v1425_v19 = vadd.f32 %v1424_v24, %v1394_v17  ;;  %v1395_v57 = vmul.f32 %v1350_v8, %v1171_v23  ;;  %v1172_v28 = vmax.f32 %v1132_v51, 0.0  ;;  %v1632_v53 = vpop.f32.mrb[40].mxu1 }
 0x249   :  { %v1633_v4 = vpop.f32.mrb[41].mxu1 }
 0x24a   :  { %v1426_v54 = vadd.f32 %v1425_v19, %v1395_v57  ;;  %v1396_v26 = vmul.f32 %v1355_v7, %v1172_v28  ;;  %v1634_v0 = vadd.f32 %v1633_v4, %v1632_v53  ;;  %v1635_v63 = vpop.f32.mrb[42].mxu1 }
 0x24b   :  { %v1636_v12 = vpop.f32.mrb[43].mxu1 }
 0x24c   :  { %v1427_v38 = vadd.f32 %v1426_v54, %v1396_v26  ;;  %v1137_v9 = vadd.f32 %v1634_v0, %v815_v40  ;;  %v1637_v44 = vadd.f32 %v1636_v12, %v1635_v63 }
 0x24e   :  { %v1173_v37 = vmax.f32 %v1137_v9, 0.0  ;;  %v1140_v35 = vadd.f32 %v1637_v44, %v820_v13 }
 0x250   :  { %v1397_v33 = vmul.f32 %v1360_v15, %v1173_v37  ;;  %v1174_v49 = vmax.f32 %v1140_v35, 0.0 }
 0x252   :  { %v1428_v30 = vadd.f32 %v1427_v38, %v1397_v33  ;;  %v1398_v41 = vmul.f32 %v1365_v3, %v1174_v49 }
 0x254   :  { %v1429_v36 = vadd.f32 %v1428_v30, %v1398_v41 }
 0x256   :  { %v1430_v6 = vrot.slane %v1429_v36, 4 }
 0x258   :  { %v1431_v59 = vadd.f32 %v1430_v6, %v1429_v36 }
 0x25a   :  { %v1432_v25 = vrot.slane %v1431_v59, 2 }
 0x25c   :  { %v1433_v52 = vadd.f32 %v1432_v25, %v1431_v59 }
 0x25e   :  { %v1434_v56 = vrot.slane %v1433_v52, 1 }
 0x260   :  { %v1435_v42 = vadd.f32 %v1434_v56, %v1433_v52 }
 0x262   :  { %v1438_v39 = vadd.f32 %v1437_v60, %v1435_v42 }
 0x264   :  { %1439 = vst [vmem:[%s2491_s7] sm:$0x1] %v1438_v39 }

</bundles_post_ra>
